<compile_context>
chip_gen: v7x
topology: tpu7x:2x2x1
jax: 0.10.0
libtpu: 0.0.40
codegen_flags: <defaults>
</compile_context>

<pallas_src>
import numpy as np
import jax
import jax.numpy as jnp
from jax import lax
from jax.experimental import pallas as pl
from jax.experimental.pallas import tpu as pltpu

# Matmul operand dtype; accumulation is always f32 via preferred_element_type.
_MXU_DTYPE = jnp.bfloat16
# Per-grid-step lane (time) width: multiple of 256 (v6e/v7x MXU result width; 128 also fine
# on v5e).  Raise _MAX_LANE_TILE to 2048-4096 on v6e (128 MiB VMEM, add vmem_limit_bytes);
# keep <= 1024 on v7x (64 MiB VMEM).
_LANE_TILE = 256
_MAX_LANE_TILE = 1024


def _round_up(n, m):
    return (n + m - 1) // m * m


# ---------------------------------------------------------------------------
# Fused kernel body: one MXU matmul per time tile.
# ---------------------------------------------------------------------------
def _fused_kernel(xs_ref, a_ref, b2_ref, o_ref):
    # xs_ref : (Kdepth_pad, TILE_N)  bf16  tap+shift-stacked operand (time tile)
    # a_ref  : (Rout_pad, Kdepth_pad) bf16 combined conv/upsample/convT weights (resident)
    # b2_ref : (Rout_pad, 1)          f32  stage-2 bias per output phase row (resident)
    # o_ref  : (Rout_pad, TILE_N)     f32  output: phase-major rows, time on lanes
    o_ref[...] = (jnp.dot(a_ref[...], xs_ref[...], preferred_element_type=jnp.float32)
                  + b2_ref[...])


# ---------------------------------------------------------------------------
# Static fusion plan (host-side NumPy): combined weights + first-call bookkeeping.
# ---------------------------------------------------------------------------
def _build_plan(params, L):
    (w0, b0, K0, S0), SF, (w2, b2, K2, S2) = params
    w0 = np.asarray(w0, np.float64)
    b0 = np.asarray(b0, np.float64)
    w2 = np.asarray(w2, np.float64)
    b2 = np.asarray(b2, np.float64)
    C_mid, C_in, _ = w0.shape
    assert w2.shape[0] == C_mid
    C_out = w2.shape[1]

    pad0 = K0 // 2
    T0 = (L + 2 * pad0 - K0) // S0 + 1                       # StreamableConv1D out length
    pad2 = K2 // 2

    # ---- first-call bad-length bookkeeping (mirrors the torch module exactly) ----
    good_len0 = (L + 2 * pad0) - 0 - pad0
    good_out0 = max(0, int((good_len0 - K0) / S0 + 1))       # module uses float div + int()
    bad0 = T0 - good_out0
    bad1 = bad0 * SF                                          # StreambleConstInterpolation
    T2 = T0 * SF
    out_pad2 = S2 - 1
    overlap2 = max(0, K2 - S2)
    right_discard = pad2 - out_pad2
    assert right_discard >= 0 and K2 >= S2, "module enforces pad=K//2, out_pad=S-1, S<K"
    good_in2 = max(0, T2 - bad1)
    good_out_len = (good_in2 - 1) * S2 + K2 if good_in2 > 0 else 0
    bad_out_piece = (bad1 - 1) * S2 + K2 if bad1 > 0 else 0
    buffer_end = good_out_len
    bad_out_start = 0
    if bad1 > 0:
        bad_out_start = max(0, buffer_end - overlap2)
        buffer_end = bad_out_start + bad_out_piece
    out_len2 = buffer_end - right_discard - pad2              # == T0*SF*S2 on the first call
    if bad1 > 0:
        bad2 = min(out_len2, buffer_end - right_discard - bad_out_start)
    else:
        bad2 = min(out_len2, pad2)

    # ---- composite polyphase taps:  out[:, n*P + p] = b2 + sum_{(d,k) in taps_p} w2T_k @ y0[:, n+d]
    P = SF * S2
    taps = []                                                 # (phase p, shift d, tap k)
    for p in range(P):
        r = (p + pad2) % S2
        a = (p + pad2) // S2
        for k in range(r, K2, S2):
            j = (k - r) // S2
            taps.append((p, (a - j) // SF, k))
    min_d = min(d for _, d, _ in taps)
    max_d = max(d for _, d, _ in taps)
    D = max_d - min_d + 1

    # ---- combined weights: stage-0 conv (+ bias ones-row) pre-contracted into stage-2 ----
    # Per-shift contraction block = K0*C_in x-taps + 1 masked ones-row carrying b0.
    Kb = K0 * C_in + 1
    W0e = np.concatenate(
        [w0.transpose(0, 2, 1).reshape(C_mid, K0 * C_in), b0[:, None]], axis=1)
    Rout = P * C_out
    A = np.zeros((Rout, D * Kb), np.float64)
    for p, d, k in taps:
        blk = d - min_d
        A[p * C_out:(p + 1) * C_out, blk * Kb:(blk + 1) * Kb] += w2[:, :, k].T @ W0e
    b2_st = np.tile(b2, P).reshape(Rout, 1)

    # sublane-friendly padding of the contraction depth and the output-row count
    Kdepth = D * Kb
    Kdepth_pad = _round_up(Kdepth, 8)
    Rout_pad = _round_up(Rout, 8)
    A_pad = np.zeros((Rout_pad, Kdepth_pad), np.float32)
    A_pad[:Rout, :Kdepth] = A
    b2_pad = np.zeros((Rout_pad, 1), np.float32)
    b2_pad[:Rout, :] = b2_st

    return dict(K0=K0, S0=S0, pad0=pad0, T0=T0, P=P, C_in=C_in, C_out=C_out,
                min_d=min_d, max_d=max_d, Kdepth=Kdepth, Kdepth_pad=Kdepth_pad,
                Rout=Rout, Rout_pad=Rout_pad, out_len2=out_len2, bad2=bad2,
                A=A_pad, b2=b2_pad)


# ---------------------------------------------------------------------------
# StreamableModel forward (first call on a fresh module)
# ---------------------------------------------------------------------------
def streamable_model_forward(x, params):
    """Returns (output_buffer, bad_output_length) exactly as StreamableModel.forward
    would on its first call with zeroed stream buffers."""
    # TODO(synk): persistent cross-call streaming state (buffer rolls, input/output counters,
    # corrected-sample re-compute) is host-side Python state in the original module; only the
    # first call is reproduced here.
    assert x.shape[0] == 1, "module's internal stream buffers are batch-1 (1, C, T)"
    L = x.shape[2]
    plan = _build_plan(params, L)
    K0, S0, pad0, T0 = plan["K0"], plan["S0"], plan["pad0"], plan["T0"]
    C_out, P = plan["C_out"], plan["P"]
    min_d, max_d = plan["min_d"], plan["max_d"]
    Kdepth, Kdepth_pad = plan["Kdepth"], plan["Kdepth_pad"]
    Rout, Rout_pad = plan["Rout"], plan["Rout_pad"]

    # ---- time tiling (lane axis): bounded VMEM per step, double-buffered by the grid ----
    tile_n = min(_round_up(max(T0, 1), _LANE_TILE), _MAX_LANE_TILE)
    T_pad = _round_up(max(T0, 1), tile_n)
    num_tiles = T_pad // tile_n

    # ---- glue: tap+shift-stacked operand.  Column n of shift-block d holds the stage-0
    # im2col taps (plus the bias ones-row) of conv-output column n+d; columns with n+d
    # outside [0, T0) are exactly zero (bias row included), which is what the folded
    # ConvTranspose relies on.  Masking happens on f32 zeros before the bf16 cast.
    # TODO(synk): at very large buffer_length (and on v5e) this D*K0 stacking should move
    # in-kernel (haloed x BlockSpec + pltpu.roll / strided pl.ds reads) to keep HBM input
    # reads ~1x of the raw input; built in glue here since at these channel counts the
    # stacked operand is only ~2x the output bytes.
    x2 = x[0].astype(jnp.float32)
    x_padded = jnp.pad(x2, ((0, 0), (pad0, pad0)))
    cols = [x_padded[:, k:k + (T0 - 1) * S0 + 1:S0] for k in range(K0)]    # im2col taps
    X0e = jnp.concatenate(cols + [jnp.ones((1, T0), jnp.float32)], axis=0)  # + bias ones-row
    padL = max(0, -min_d)
    padR = max(0, max_d) + (T_pad - T0)
    X0e = jnp.pad(X0e, ((0, 0), (padL, padR)))
    Xs = jnp.concatenate(
        [X0e[:, padL + d: padL + d + T_pad] for d in range(min_d, max_d + 1)], axis=0)
    Xs = jnp.pad(Xs, ((0, Kdepth_pad - Kdepth), (0, 0))).astype(_MXU_DTYPE)

    A = jnp.asarray(plan["A"], dtype=_MXU_DTYPE)       # (Rout_pad, Kdepth_pad) resident
    b2v = jnp.asarray(plan["b2"], dtype=jnp.float32)   # (Rout_pad, 1)          resident

    cost = pl.CostEstimate(
        flops=2 * Rout_pad * Kdepth_pad * T_pad,
        transcendentals=0,
        bytes_accessed=(Xs.size * Xs.dtype.itemsize + A.size * A.dtype.itemsize
                        + b2v.size * 4 + Rout_pad * T_pad * 4))

    out_stacked = pl.pallas_call(
        _fused_kernel,
        out_shape=jax.ShapeDtypeStruct((Rout_pad, T_pad), jnp.float32),
        grid_spec=pltpu.PrefetchScalarGridSpec(
            num_scalar_prefetch=0,
            grid=(num_tiles,),
            in_specs=[
                pl.BlockSpec((Kdepth_pad, tile_n), lambda i: (0, i)),    # time-tiled operand
                pl.BlockSpec((Rout_pad, Kdepth_pad), lambda i: (0, 0)),  # VMEM-resident weights
                pl.BlockSpec((Rout_pad, 1), lambda i: (0, 0)),           # VMEM-resident bias
            ],
            out_specs=pl.BlockSpec((Rout_pad, tile_n), lambda i: (0, i)),
        ),
        compiler_params=pltpu.CompilerParams(
            # independent time tiles -> megacore / v7x 2nd TensorCore splits the time axis
            dimension_semantics=("parallel",),
        ),
        cost_estimate=cost,
    )(Xs, A, b2v)

    # phase interleave (P*C_out, T0) -> (C_out, T0*P).  NOTE: this is a full HBM relayout by
    # XLA; for streaming-size buffers keep the phase-major layout or fuse it into the consumer.
    out = (out_stacked[:Rout, :T0]
           .reshape(P, C_out, T0)
           .transpose(1, 2, 0)
           .reshape(C_out, T0 * P))
    assert out.shape[1] == plan["out_len2"]
    return out[None], plan["bad2"]


# ---------------------------------------------------------------------------
if __name__ == "__main__":
    key = jax.random.PRNGKey(0)
    kw0, kb0, kw2, kb2, kx = jax.random.split(key, 5)

    B, C_in, L = 1, 4, 16          # StreamableModel(buffer_length=16, ...)
    C_mid, C_out = 8, 4
    K0, S0 = 5, 2                  # nn.Conv1d(4, 8, 5, stride=2, padding=2)
    SF = 2                         # nn.Upsample(scale_factor=2, mode='nearest')
    K2, S2 = 5, 2                  # nn.ConvTranspose1d(8, 4, 5, stride=2, padding=2, output_padding=1)

    w0 = 0.1 * jax.random.normal(kw0, (C_mid, C_in, K0), jnp.float32)
    b0 = 0.1 * jax.random.normal(kb0, (C_mid,), jnp.float32)
    w2 = 0.1 * jax.random.normal(kw2, (C_mid, C_out, K2), jnp.float32)  # torch ConvT layout (in, out, K)
    b2 = 0.1 * jax.random.normal(kb2, (C_out,), jnp.float32)
    x = jax.random.normal(kx, (B, C_in, L), jnp.float32)

    params = ((w0, b0, K0, S0), SF, (w2, b2, K2, S2))
    out, bad = streamable_model_forward(x, params)
    out = jax.block_until_ready(out)

    # --- plain-JAX f32 reference for the whole fused pipeline ---
    pad0, pad2 = K0 // 2, K2 // 2
    ref_y0 = lax.conv_general_dilated(
        x, w0, window_strides=(S0,), padding=[(pad0, pad0)],
        dimension_numbers=("NCH", "OIH", "NCH"))[0] + b0[:, None]
    ref_y1 = jnp.repeat(ref_y0, SF, axis=-1)
    w2_conv = jnp.flip(jnp.transpose(w2, (1, 0, 2)), axis=-1)
    ref_full = lax.conv_general_dilated(
        ref_y1[None], w2_conv, window_strides=(1,), padding=[(K2 - 1, K2 - 1)],
        lhs_dilation=(S2,), dimension_numbers=("NCH", "OIH", "NCH"))[0] + b2[:, None]
    ref_out = ref_full[:, pad2:pad2 + out.shape[-1]]

    expected_T = ((L + 2 * pad0 - K0) // S0 + 1) * SF * S2
    assert out.shape == (1, C_out, expected_T), out.shape
    # bf16 MXU operands (f32 accumulation): compare with a bf16-appropriate tolerance.
    err = float(jnp.max(jnp.abs(out[0] - ref_out)))
    assert err < 2e-2, f"fused kernel mismatch, max abs err {err}"
    assert bad == 6, bad
    print("KERNEL_OK")
</pallas_src>

<mosaic_0001>
module attributes {stable_mosaic.version = 11 : i64} {
  func.func @_fused_kernel(%arg0: i32, %arg1: memref<64x256xbf16, #tpu.memory_space<vmem>>, %arg2: memref<16x64xbf16, #tpu.memory_space<vmem>>, %arg3: memref<16x1xf32, #tpu.memory_space<vmem>>, %arg4: memref<16x256xf32, #tpu.memory_space<vmem>>) attributes {dimension_semantics = [#tpu.dimension_semantics<parallel>], iteration_bounds = array<i64: 1>, scalar_prefetch = 0 : i64, scratch_operands = 0 : i64, tpu.core_type = #tpu.core_type<tc>, window_params = [{transform_indices = @transform_0, window_bounds = array<i64: 64, 256>}, {pipeline_mode = #tpu.pipeline_mode<synchronous>, transform_indices = @transform_1, window_bounds = array<i64: 16, 64>}, {pipeline_mode = #tpu.pipeline_mode<synchronous>, transform_indices = @transform_2, window_bounds = array<i64: 16, 1>}, {transform_indices = @transform_3, window_bounds = array<i64: 16, 256>}]} {
    %c0 = arith.constant 0 : index
    %c0_0 = arith.constant 0 : index
    %0 = vector.load %arg2[%c0, %c0_0] : memref<16x64xbf16, #tpu.memory_space<vmem>>, vector<16x64xbf16>
    %c0_1 = arith.constant 0 : index
    %c0_2 = arith.constant 0 : index
    %1 = vector.load %arg1[%c0_1, %c0_2] : memref<64x256xbf16, #tpu.memory_space<vmem>>, vector<64x256xbf16>
    %cst = arith.constant dense<0.000000e+00> : vector<16x256xf32>
    %2 = tpu.matmul %0, %1, %cst {dimension_numbers = #tpu.dot_dimension_numbers<[1], [0], [0], [1], [0, 0, 1, 1], [], []>} : vector<16x64xbf16>, vector<64x256xbf16>, vector<16x256xf32> -> vector<16x256xf32>
    %c0_3 = arith.constant 0 : index
    %c0_4 = arith.constant 0 : index
    %3 = vector.load %arg3[%c0_3, %c0_4] : memref<16x1xf32, #tpu.memory_space<vmem>>, vector<16x1xf32>
    %4 = vector.broadcast %3 : vector<16x1xf32> to vector<16x256xf32>
    %5 = arith.addf %2, %4 : vector<16x256xf32>
    %c0_5 = arith.constant 0 : index
    %c0_6 = arith.constant 0 : index
    %6 = vector.load %arg4[%c0_5, %c0_6] : memref<16x256xf32, #tpu.memory_space<vmem>>, vector<16x256xf32>
    tpu.vector_store %arg4[%c0_5, %c0_6], %5 {strides = array<i32>} : memref<16x256xf32, #tpu.memory_space<vmem>>, vector<16x256xf32>,
    return
  }
  func.func @transform_0(%arg0: i32) -> (i32, i32) {
    %c0_i32 = arith.constant 0 : i32
    %c0_i32_0 = arith.constant 0 : i32
    return %c0_i32, %arg0 : i32, i32
  }
  func.func @transform_1(%arg0: i32) -> (i32, i32) {
    %c0_i32 = arith.constant 0 : i32
    %c0_i32_0 = arith.constant 0 : i32
    %c0_i32_1 = arith.constant 0 : i32
    return %c0_i32, %c0_i32_0 : i32, i32
  }
  func.func @transform_2(%arg0: i32) -> (i32, i32) {
    %c0_i32 = arith.constant 0 : i32
    %c0_i32_0 = arith.constant 0 : i32
    %c0_i32_1 = arith.constant 0 : i32
    return %c0_i32, %c0_i32_0 : i32, i32
  }
  func.func @transform_3(%arg0: i32) -> (i32, i32) {
    %c0_i32 = arith.constant 0 : i32
    %c0_i32_0 = arith.constant 0 : i32
    return %c0_i32, %arg0 : i32, i32
  }
}

</mosaic_0001>

<bundles_post_ra>
// kernel: tpu_custom_call.1
= control target key start
LH: loop header
LB: loop body
LE: loop exit
PB: predicated region body
PF: predicated region fallthrough
CT: control target
= control target key end

     0   :  { %8 = vsyncpa [#allocation3], 0  ;;  %s304_s0 = inlined_call_operand.hbm [shape: bf16[64,256], index: 0, kind: input, shape index: {}]   ;;  %s305_s1 = inlined_call_operand.vmem [shape: bf16[16,64], index: 1, kind: input, shape index: {}]   ;;  %s306_s2 = inlined_call_operand.vmem [shape: f32[16,1], index: 2, kind: input, shape index: {}]   ;;  %s307_s3 = inlined_call_operand.hbm [shape: f32[16,256], index: 3, kind: output, shape index: {}]  }
   0x1   :  { %9 = vsyncpa [#allocation4], 0  ;;  %s244_s12 = smov [#allocation2]   ;;  %s196_s16 = scalar_lea.hbm %s304_s0, 1024 }
   0x2   :  { %s15_s13 = sshll.u32 %s244_s12, 4  ;;  %p197_p0 = scmp.ne.s32.totalorder %s304_s0, %s196_s16  ;;  %s16_s13 = int_to_ptr.vmem [resolvable:$true] %s15_s13 }
   0x3   :  { %p200_p1 = scmp.lt.u32.totalorder %s196_s16, %s304_s0 }
   0x5   :  { %p202_p2 = pnand %p200_p1, %p197_p0 }
   0x7   :  { %205 = shalt.err (!%p202_p2)
}
   0x8   :  { %s206_s21 = scalar_lea.vmem %s16_s13, 1024  ;;  %p211_p4 = scmp.lt.s32.totalorder %s16_s13, %s16_s13 }
   0x9   :  { %p207_p3 = scmp.ne.s32.totalorder %s16_s13, %s206_s21  ;;  %p212_p5 = scmp.lt.s32.totalorder %s206_s21, %s206_s21 }
   0xb   :  { %p213_p6 = por %p212_p5, %p211_p4 }
   0xd   :  { %p214_p7 = pnand %p213_p6, %p207_p3 }
   0xf   :  { %217 = shalt.err (!%p214_p7)
}
  0x10   :  { %s245_s22 = smov 128   ;;  %s246_s23 = smov 8  }
  0x11   :  { %21 = dma.hbm_to_vmem [thread:$0]  %s304_s0, 1024, %s16_s13, [#allocation3], %s245_s22, %s245_s22, %s246_s23  }
  0x12   :  { %240 = dma.done.wait [#allocation3], 1024  }
  0x13   :  { %241 = vsyncadd [#allocation3], 4294966272  ;;  %v247_v0 = vmov 0   ;;  %v183_v1 = vld [vmem:[#allocation2 + $0x4] ss:$8 sps:$4 sm:$0xff]   ;;  %vm97_vm0 = vcmask 523264  }
  0x14   :  { %133 = vmatprep.mubr.bf16.mxu0 %v247_v0  ;;  %182 = vset.pattern.permute.xlu0 %v247_v0  ;;  %v185_v2 = vld [vmem:[#allocation2] ss:$8 sps:$4 sm:$0xff]   ;;  %v186_v3 = vld [vmem:[#allocation2 + $0x14] ss:$8 sps:$4 sm:$0xff]   ;;  %v188_v4 = vld [vmem:[#allocation2 + $0x10] ss:$8 sps:$4 sm:$0xff]  }
  0x15   :  { %101 = vmatprep.subr.bf16.mxu0 %v183_v1  ;;  %v189_v5 = vld [vmem:[#allocation2 + $0x24] ss:$8 sps:$4 sm:$0xff]   ;;  %v191_v7 = vld [vmem:[#allocation2 + $0x20] ss:$8 sps:$4 sm:$0xff]   ;;  %v192_v8 = vld [vmem:[#allocation2 + $0x34] ss:$8 sps:$4 sm:$0xff]  }
  0x16   :  { %102 = vmatpush1.bf16.msra.mxu0 %v185_v2  ;;  %v40_v6 = vld [vmem:[%s306_s2] sm:$0xff]  ;;  %v41_v9 = vld [vmem:[%s306_s2 + $0x8] sm:$0xff]  ;;  %v194_v10 = vld [vmem:[#allocation2 + $0x30] ss:$8 sps:$4 sm:$0xff]   ;;  %s248_s4 = smov [#allocation5]  }
  0x17   :  { %103 = vmatprep.subr.bf16.mxu0 %v186_v3  ;;  %44 = vperm.xlu0 %182, %v40_v6   ;;  %v195_v11 = vld [vmem:[%s305_s1] sm:$0xff]   ;;  %s153_s5 = sshll.u32 %s248_s4, 4  ;;  %s154_s5 = int_to_ptr.vmem [resolvable:$true] %s153_s5 }
  0x18   :  { %s218_s1 = scalar_lea.vmem %s154_s5, 512  ;;  %p223_p9 = scmp.lt.s32.totalorder %s154_s5, %s154_s5 }
  0x19   :  { %p219_p8 = scmp.ne.s32.totalorder %s154_s5, %s218_s1  ;;  %p224_p10 = scmp.lt.s32.totalorder %s218_s1, %s218_s1 }
  0x1a   :  { %104 = vmatpush1.bf16.msra.mxu0 %v188_v4 }
  0x1b   :  { %105 = vmatprep.subr.bf16.mxu0 %v189_v5  ;;  %49 = vperm.xlu0 %182, %v41_v9   ;;  %p225_p11 = por %p224_p10, %p223_p9 }
  0x1d   :  { %p226_p12 = pnand %p225_p11, %p219_p8 }
  0x1e   :  { %106 = vmatpush1.bf16.msra.mxu0 %v191_v7 }
  0x1f   :  { %107 = vmatprep.subr.bf16.mxu0 %v192_v8 }
  0x22   :  { %108 = vmatpush1.bf16.msra.mxu0 %v194_v10 }
  0x25   :  { %174 = vmatmul.mubr.msk.bf16.vlgmr.msra.gmra.mrb[0].mxu0 %vm97_vm0, %v195_v11 }
  0x96   :  { %v45_v12 = vpop.permute.xlu0 %44 }
  0x9a   :  { %v50_v16 = vpop.permute.xlu0 %49 }
  0xf8   :  { %v135_v13 = vpop.f32.mrb[0].mxu0 }
  0xf9   :  { %v136_v14 = vadd.f32 %v135_v13, %v45_v12  ;;  %v137_v15 = vpop.f32.mrb[1].mxu0 }
  0xfa   :  { %v138_v17 = vadd.f32 %v137_v15, %v45_v12  ;;  %v139_v18 = vpop.f32.mrb[2].mxu0 }
  0xfb   :  { %144 = vst [vmem:[#allocation5] sm:$0xff] %v136_v14  ;;  %v140_v19 = vadd.f32 %v139_v18, %v50_v16  ;;  %v141_v20 = vpop.f32.mrb[3].mxu0 }
  0xfc   :  { %145 = vst [vmem:[#allocation5 + $0x8] sm:$0xff] %v138_v17  ;;  %v142_v21 = vadd.f32 %v141_v20, %v50_v16 }
  0xfd   :  { %146 = vst [vmem:[#allocation5 + $0x10] sm:$0xff] %v140_v19 }
  0xfe   :  { %147 = vst [vmem:[#allocation5 + $0x18] sm:$0xff] %v142_v21 }
  0xff   :  { %229 = shalt.err (!%p226_p12)
}
 0x100   :  { %s230_s7 = scalar_lea.hbm %s307_s3, 512 }
 0x101   :  { %p231_p13 = scmp.ne.s32.totalorder %s307_s3, %s230_s7  ;;  %p234_p0 = scmp.lt.u32.totalorder %s230_s7, %s307_s3 }
 0x103   :  { %p236_p1 = pnand %p234_p0, %p231_p13 }
 0x105   :  { %239 = shalt.err (!%p236_p1)
}
 0x106   :  { %s249_s12 = smov 256   ;;  %s250_s13 = smov 16  }
 0x107   :  { %159 = dma.vmem_to_hbm [thread:$0]  %s154_s5, 512, %s307_s3, [#allocation4], %s249_s12, %s249_s12, %s250_s13  }
 0x108   :  { %242 = dma.done.wait [#allocation4], 512  }
 0x109   :  { %243 = vsyncadd [#allocation4], 4294966784 }
 0x10a   :  { %163 = vsyncpa [#allocation3], 1 }
 0x10b   :  { %164 = vsyncpa [#allocation4], 1 }

</bundles_post_ra>
